<compile_context>
chip_gen: v5e
topology: v5e:2x2
jax: 0.10.0
libtpu: 0.0.40
codegen_flags: <defaults>
</compile_context>

<pallas_src>
import jax
import jax.numpy as jnp
from jax.experimental import pallas as pl
from jax.experimental.pallas import tpu as pltpu


def _fuzzy_hedge_kernel(x_ref, e_ref, o_ref, acc_ref):
    # x_ref  : (TN, KC)  tile of x           (samples, K chunk)
    # e_ref  : (KC, TM)  tile of exponent^T  (K chunk, out_features)
    # o_ref  : (TN, TM)  output tile (samples, out_features) — lane dense
    # acc_ref: (TN, TM)  running min of e*log(x) across K chunks (VMEM scratch)
    kk = pl.program_id(2)

    @pl.when(kk == 0)
    def _init():
        acc_ref[...] = jnp.full(acc_ref.shape, jnp.inf, dtype=jnp.float32)

    x_blk = x_ref[...]                                        # (TN, KC)
    # log once per x tile; clamp -inf (x == 0) to a large finite negative so
    # that exponent == 0 yields 0 * (-1e30) = 0 -> x**0 == 1 (no NaN).
    lx = jnp.maximum(jnp.log(x_blk), jnp.float32(-1e30))      # (TN, KC)
    e_blk = e_ref[...]                                        # (KC, TM)

    acc = acc_ref[...]
    for kc in range(e_blk.shape[0]):      # static unroll over the K chunk
        # outer-product candidate: lx[u, kc] * e[kc, i]  -> pure VPU mul+min
        cand = lx[:, kc:kc + 1] * e_blk[kc:kc + 1, :]         # (TN, TM)
        acc = jnp.minimum(acc, cand)
    acc_ref[...] = acc

    @pl.when(kk == pl.num_programs(2) - 1)
    def _finish():
        # single exp per output element (monotone, so it commutes with min)
        o_ref[...] = jnp.exp(acc_ref[...]).astype(o_ref.dtype)


def _round_up(v, mult):
    return ((v + mult - 1) // mult) * mult


def fuzzy_hedge_layer(x, exponent):
    """result[u, i] = min_k( x[u, k] ** exponent[i, k] )  — Pallas TPU impl.

    Args:
      x:        (n_samples, in_features) float
      exponent: (out_features, in_features) float
    Returns:
      (n_samples, out_features) float32
    """
    x = jnp.asarray(x, jnp.float32)
    exponent = jnp.asarray(exponent, jnp.float32)
    n, k = x.shape
    m, k2 = exponent.shape
    assert k == k2, "in_features mismatch"

    # --- tile sizes (bounded VMEM, lane-dense output, parallel-friendly) ---
    TN = 128 if n > 128 else _round_up(n, 8)     # samples  (sublane axis)
    n_pad = _round_up(n, TN)
    TM = 128                                     # out_features (lane axis)
    m_pad = _round_up(m, TM)
    if k <= 128:
        KC, k_pad = k, k                         # single K chunk, no K pad
    else:
        KC = 128
        k_pad = _round_up(k, KC)

    # Padded K columns use x = 0 (clamped log -> -1e30) and exponent = -1 so
    # the candidate is +1e30 and never wins the min; padded sample rows and
    # padded out_feature columns are sliced off at the end.
    x_p = jnp.zeros((n_pad, k_pad), jnp.float32).at[:n, :k].set(x)
    e_t = jnp.full((k_pad, m_pad), -1.0, jnp.float32).at[:k, :m].set(exponent.T)

    grid = (n_pad // TN, m_pad // TM, k_pad // KC)

    out = pl.pallas_call(
        _fuzzy_hedge_kernel,
        out_shape=jax.ShapeDtypeStruct((n_pad, m_pad), jnp.float32),
        grid_spec=pltpu.PrefetchScalarGridSpec(
            num_scalar_prefetch=0,
            grid=grid,
            in_specs=[
                # x: tiled over samples and K; constant along the j axis so it
                # is only re-DMA'd when i or kk changes.
                pl.BlockSpec((TN, KC), lambda i, j, kk: (i, kk)),
                # exponent^T: tiled over K and out_features.
                pl.BlockSpec((KC, TM), lambda i, j, kk: (kk, j)),
            ],
            # Output block is constant along the (last, "arbitrary") K axis ->
            # stays resident as the accumulator target.
            out_specs=pl.BlockSpec((TN, TM), lambda i, j, kk: (i, j)),
            scratch_shapes=[pltpu.VMEM((TN, TM), jnp.float32)],
        ),
        compiler_params=pltpu.CompilerParams(
            dimension_semantics=("parallel", "parallel", "arbitrary"),
        ),
    )(x_p, e_t)

    return out[:n, :m]


if __name__ == "__main__":
    # Small shapes consistent with the module.
    n_samples = 8
    in_features = 16
    out_features = 16

    key = jax.random.PRNGKey(0)
    kx, ke = jax.random.split(key)

    # Fuzzy membership values in [0, 1] (positive, so fractional powers are
    # well defined — matches the intended usage of this layer).
    x = jax.random.uniform(kx, (n_samples, in_features), dtype=jnp.float32)
    # nn.init.uniform_ default is U(0, 1).
    exponent = jax.random.uniform(
        ke, (out_features, in_features), dtype=jnp.float32
    )

    out = fuzzy_hedge_layer(x, exponent)
    out = jax.block_until_ready(out)

    # Pure-JAX reference of the nested-loop PyTorch semantics (min t-norm).
    ref = jnp.min(jnp.power(x[:, None, :], exponent[None, :, :]), axis=-1)
    assert out.shape == (n_samples, out_features)
    assert jnp.allclose(out, ref, rtol=1e-5, atol=1e-5), "mismatch vs reference"

    print("KERNEL_OK")
</pallas_src>

<mosaic_0001>
module attributes {stable_mosaic.version = 11 : i64} {
  func.func @_fuzzy_hedge_kernel(%arg0: i32, %arg1: i32, %arg2: i32, %arg3: memref<8x16xf32, #tpu.memory_space<vmem>>, %arg4: memref<16x128xf32, #tpu.memory_space<vmem>>, %arg5: memref<8x128xf32, #tpu.memory_space<vmem>>, %arg6: memref<8x128xf32, #tpu.memory_space<vmem>>) attributes {dimension_semantics = [#tpu.dimension_semantics<parallel>, #tpu.dimension_semantics<parallel>, #tpu.dimension_semantics<arbitrary>], iteration_bounds = array<i64: 1, 1, 1>, scalar_prefetch = 0 : i64, scratch_operands = 1 : i64, tpu.core_type = #tpu.core_type<tc>, window_params = [{transform_indices = @transform_0, window_bounds = array<i64: 8, 16>}, {transform_indices = @transform_1, window_bounds = array<i64: 16, 128>}, {transform_indices = @transform_2, window_bounds = array<i64: 8, 128>}]} {
    %c0_i32 = arith.constant 0 : i32
    %0 = arith.cmpi eq, %arg2, %c0_i32 : i32
    %1 = arith.extui %0 : i1 to i32
    %c0_i32_0 = arith.constant 0 : i32
    %2 = arith.cmpi ne, %1, %c0_i32_0 : i32
    scf.if %2 {
      %cst_10 = arith.constant 0x7F800000 : f32
      %109 = vector.broadcast %cst_10 : f32 to vector<8x128xf32>
      %c0_11 = arith.constant 0 : index
      %c0_12 = arith.constant 0 : index
      %110 = vector.load %arg6[%c0_11, %c0_12] : memref<8x128xf32, #tpu.memory_space<vmem>>, vector<8x128xf32>
      tpu.vector_store %arg6[%c0_11, %c0_12], %109 {strides = array<i32>} : memref<8x128xf32, #tpu.memory_space<vmem>>, vector<8x128xf32>,
    } else {
    }
    %c0 = arith.constant 0 : index
    %c0_1 = arith.constant 0 : index
    %3 = vector.load %arg3[%c0, %c0_1] : memref<8x16xf32, #tpu.memory_space<vmem>>, vector<8x16xf32>
    %4 = math.log %3 : vector<8x16xf32>
    %cst = arith.constant -1.000000e+30 : f32
    %5 = vector.broadcast %cst : f32 to vector<8x16xf32>
    %6 = arith.maximumf %4, %5 : vector<8x16xf32>
    %c0_2 = arith.constant 0 : index
    %c0_3 = arith.constant 0 : index
    %7 = vector.load %arg4[%c0_2, %c0_3] : memref<16x128xf32, #tpu.memory_space<vmem>>, vector<16x128xf32>
    %c0_4 = arith.constant 0 : index
    %c0_5 = arith.constant 0 : index
    %8 = vector.load %arg6[%c0_4, %c0_5] : memref<8x128xf32, #tpu.memory_space<vmem>>, vector<8x128xf32>
    %9 = vector.extract_strided_slice %6 {offsets = [0, 0], sizes = [8, 1], strides = [1, 1]} : vector<8x16xf32> to vector<8x1xf32>
    %10 = vector.extract_strided_slice %7 {offsets = [0, 0], sizes = [1, 128], strides = [1, 1]} : vector<16x128xf32> to vector<1x128xf32>
    %11 = vector.broadcast %9 : vector<8x1xf32> to vector<8x128xf32>
    %12 = vector.broadcast %10 : vector<1x128xf32> to vector<8x128xf32>
    %13 = arith.mulf %11, %12 : vector<8x128xf32>
    %14 = arith.minimumf %8, %13 : vector<8x128xf32>
    %15 = vector.extract_strided_slice %6 {offsets = [0, 1], sizes = [8, 1], strides = [1, 1]} : vector<8x16xf32> to vector<8x1xf32>
    %16 = vector.extract_strided_slice %7 {offsets = [1, 0], sizes = [1, 128], strides = [1, 1]} : vector<16x128xf32> to vector<1x128xf32>
    %17 = vector.broadcast %15 : vector<8x1xf32> to vector<8x128xf32>
    %18 = vector.broadcast %16 : vector<1x128xf32> to vector<8x128xf32>
    %19 = arith.mulf %17, %18 : vector<8x128xf32>
    %20 = arith.minimumf %14, %19 : vector<8x128xf32>
    %21 = vector.extract_strided_slice %6 {offsets = [0, 2], sizes = [8, 1], strides = [1, 1]} : vector<8x16xf32> to vector<8x1xf32>
    %22 = vector.extract_strided_slice %7 {offsets = [2, 0], sizes = [1, 128], strides = [1, 1]} : vector<16x128xf32> to vector<1x128xf32>
    %23 = vector.broadcast %21 : vector<8x1xf32> to vector<8x128xf32>
    %24 = vector.broadcast %22 : vector<1x128xf32> to vector<8x128xf32>
    %25 = arith.mulf %23, %24 : vector<8x128xf32>
    %26 = arith.minimumf %20, %25 : vector<8x128xf32>
    %27 = vector.extract_strided_slice %6 {offsets = [0, 3], sizes = [8, 1], strides = [1, 1]} : vector<8x16xf32> to vector<8x1xf32>
    %28 = vector.extract_strided_slice %7 {offsets = [3, 0], sizes = [1, 128], strides = [1, 1]} : vector<16x128xf32> to vector<1x128xf32>
    %29 = vector.broadcast %27 : vector<8x1xf32> to vector<8x128xf32>
    %30 = vector.broadcast %28 : vector<1x128xf32> to vector<8x128xf32>
    %31 = arith.mulf %29, %30 : vector<8x128xf32>
    %32 = arith.minimumf %26, %31 : vector<8x128xf32>
    %33 = vector.extract_strided_slice %6 {offsets = [0, 4], sizes = [8, 1], strides = [1, 1]} : vector<8x16xf32> to vector<8x1xf32>
    %34 = vector.extract_strided_slice %7 {offsets = [4, 0], sizes = [1, 128], strides = [1, 1]} : vector<16x128xf32> to vector<1x128xf32>
    %35 = vector.broadcast %33 : vector<8x1xf32> to vector<8x128xf32>
    %36 = vector.broadcast %34 : vector<1x128xf32> to vector<8x128xf32>
    %37 = arith.mulf %35, %36 : vector<8x128xf32>
    %38 = arith.minimumf %32, %37 : vector<8x128xf32>
    %39 = vector.extract_strided_slice %6 {offsets = [0, 5], sizes = [8, 1], strides = [1, 1]} : vector<8x16xf32> to vector<8x1xf32>
    %40 = vector.extract_strided_slice %7 {offsets = [5, 0], sizes = [1, 128], strides = [1, 1]} : vector<16x128xf32> to vector<1x128xf32>
    %41 = vector.broadcast %39 : vector<8x1xf32> to vector<8x128xf32>
    %42 = vector.broadcast %40 : vector<1x128xf32> to vector<8x128xf32>
    %43 = arith.mulf %41, %42 : vector<8x128xf32>
    %44 = arith.minimumf %38, %43 : vector<8x128xf32>
    %45 = vector.extract_strided_slice %6 {offsets = [0, 6], sizes = [8, 1], strides = [1, 1]} : vector<8x16xf32> to vector<8x1xf32>
    %46 = vector.extract_strided_slice %7 {offsets = [6, 0], sizes = [1, 128], strides = [1, 1]} : vector<16x128xf32> to vector<1x128xf32>
    %47 = vector.broadcast %45 : vector<8x1xf32> to vector<8x128xf32>
    %48 = vector.broadcast %46 : vector<1x128xf32> to vector<8x128xf32>
    %49 = arith.mulf %47, %48 : vector<8x128xf32>
    %50 = arith.minimumf %44, %49 : vector<8x128xf32>
    %51 = vector.extract_strided_slice %6 {offsets = [0, 7], sizes = [8, 1], strides = [1, 1]} : vector<8x16xf32> to vector<8x1xf32>
    %52 = vector.extract_strided_slice %7 {offsets = [7, 0], sizes = [1, 128], strides = [1, 1]} : vector<16x128xf32> to vector<1x128xf32>
    %53 = vector.broadcast %51 : vector<8x1xf32> to vector<8x128xf32>
    %54 = vector.broadcast %52 : vector<1x128xf32> to vector<8x128xf32>
    %55 = arith.mulf %53, %54 : vector<8x128xf32>
    %56 = arith.minimumf %50, %55 : vector<8x128xf32>
    %57 = vector.extract_strided_slice %6 {offsets = [0, 8], sizes = [8, 1], strides = [1, 1]} : vector<8x16xf32> to vector<8x1xf32>
    %58 = vector.extract_strided_slice %7 {offsets = [8, 0], sizes = [1, 128], strides = [1, 1]} : vector<16x128xf32> to vector<1x128xf32>
    %59 = vector.broadcast %57 : vector<8x1xf32> to vector<8x128xf32>
    %60 = vector.broadcast %58 : vector<1x128xf32> to vector<8x128xf32>
    %61 = arith.mulf %59, %60 : vector<8x128xf32>
    %62 = arith.minimumf %56, %61 : vector<8x128xf32>
    %63 = vector.extract_strided_slice %6 {offsets = [0, 9], sizes = [8, 1], strides = [1, 1]} : vector<8x16xf32> to vector<8x1xf32>
    %64 = vector.extract_strided_slice %7 {offsets = [9, 0], sizes = [1, 128], strides = [1, 1]} : vector<16x128xf32> to vector<1x128xf32>
    %65 = vector.broadcast %63 : vector<8x1xf32> to vector<8x128xf32>
    %66 = vector.broadcast %64 : vector<1x128xf32> to vector<8x128xf32>
    %67 = arith.mulf %65, %66 : vector<8x128xf32>
    %68 = arith.minimumf %62, %67 : vector<8x128xf32>
    %69 = vector.extract_strided_slice %6 {offsets = [0, 10], sizes = [8, 1], strides = [1, 1]} : vector<8x16xf32> to vector<8x1xf32>
    %70 = vector.extract_strided_slice %7 {offsets = [10, 0], sizes = [1, 128], strides = [1, 1]} : vector<16x128xf32> to vector<1x128xf32>
    %71 = vector.broadcast %69 : vector<8x1xf32> to vector<8x128xf32>
    %72 = vector.broadcast %70 : vector<1x128xf32> to vector<8x128xf32>
    %73 = arith.mulf %71, %72 : vector<8x128xf32>
    %74 = arith.minimumf %68, %73 : vector<8x128xf32>
    %75 = vector.extract_strided_slice %6 {offsets = [0, 11], sizes = [8, 1], strides = [1, 1]} : vector<8x16xf32> to vector<8x1xf32>
    %76 = vector.extract_strided_slice %7 {offsets = [11, 0], sizes = [1, 128], strides = [1, 1]} : vector<16x128xf32> to vector<1x128xf32>
    %77 = vector.broadcast %75 : vector<8x1xf32> to vector<8x128xf32>
    %78 = vector.broadcast %76 : vector<1x128xf32> to vector<8x128xf32>
    %79 = arith.mulf %77, %78 : vector<8x128xf32>
    %80 = arith.minimumf %74, %79 : vector<8x128xf32>
    %81 = vector.extract_strided_slice %6 {offsets = [0, 12], sizes = [8, 1], strides = [1, 1]} : vector<8x16xf32> to vector<8x1xf32>
    %82 = vector.extract_strided_slice %7 {offsets = [12, 0], sizes = [1, 128], strides = [1, 1]} : vector<16x128xf32> to vector<1x128xf32>
    %83 = vector.broadcast %81 : vector<8x1xf32> to vector<8x128xf32>
    %84 = vector.broadcast %82 : vector<1x128xf32> to vector<8x128xf32>
    %85 = arith.mulf %83, %84 : vector<8x128xf32>
    %86 = arith.minimumf %80, %85 : vector<8x128xf32>
    %87 = vector.extract_strided_slice %6 {offsets = [0, 13], sizes = [8, 1], strides = [1, 1]} : vector<8x16xf32> to vector<8x1xf32>
    %88 = vector.extract_strided_slice %7 {offsets = [13, 0], sizes = [1, 128], strides = [1, 1]} : vector<16x128xf32> to vector<1x128xf32>
    %89 = vector.broadcast %87 : vector<8x1xf32> to vector<8x128xf32>
    %90 = vector.broadcast %88 : vector<1x128xf32> to vector<8x128xf32>
    %91 = arith.mulf %89, %90 : vector<8x128xf32>
    %92 = arith.minimumf %86, %91 : vector<8x128xf32>
    %93 = vector.extract_strided_slice %6 {offsets = [0, 14], sizes = [8, 1], strides = [1, 1]} : vector<8x16xf32> to vector<8x1xf32>
    %94 = vector.extract_strided_slice %7 {offsets = [14, 0], sizes = [1, 128], strides = [1, 1]} : vector<16x128xf32> to vector<1x128xf32>
    %95 = vector.broadcast %93 : vector<8x1xf32> to vector<8x128xf32>
    %96 = vector.broadcast %94 : vector<1x128xf32> to vector<8x128xf32>
    %97 = arith.mulf %95, %96 : vector<8x128xf32>
    %98 = arith.minimumf %92, %97 : vector<8x128xf32>
    %99 = vector.extract_strided_slice %6 {offsets = [0, 15], sizes = [8, 1], strides = [1, 1]} : vector<8x16xf32> to vector<8x1xf32>
    %100 = vector.extract_strided_slice %7 {offsets = [15, 0], sizes = [1, 128], strides = [1, 1]} : vector<16x128xf32> to vector<1x128xf32>
    %101 = vector.broadcast %99 : vector<8x1xf32> to vector<8x128xf32>
    %102 = vector.broadcast %100 : vector<1x128xf32> to vector<8x128xf32>
    %103 = arith.mulf %101, %102 : vector<8x128xf32>
    %104 = arith.minimumf %98, %103 : vector<8x128xf32>
    %c0_6 = arith.constant 0 : index
    %c0_7 = arith.constant 0 : index
    %105 = vector.load %arg6[%c0_6, %c0_7] : memref<8x128xf32, #tpu.memory_space<vmem>>, vector<8x128xf32>
    tpu.vector_store %arg6[%c0_6, %c0_7], %104 {strides = array<i32>} : memref<8x128xf32, #tpu.memory_space<vmem>>, vector<8x128xf32>,
    %c0_i32_8 = arith.constant 0 : i32
    %106 = arith.cmpi eq, %arg2, %c0_i32_8 : i32
    %107 = arith.extui %106 : i1 to i32
    %c0_i32_9 = arith.constant 0 : i32
    %108 = arith.cmpi ne, %107, %c0_i32_9 : i32
    scf.if %108 {
      %c0_10 = arith.constant 0 : index
      %c0_11 = arith.constant 0 : index
      %109 = vector.load %arg6[%c0_10, %c0_11] : memref<8x128xf32, #tpu.memory_space<vmem>>, vector<8x128xf32>
      %110 = math.exp %109 : vector<8x128xf32>
      %c0_12 = arith.constant 0 : index
      %c0_13 = arith.constant 0 : index
      %111 = vector.load %arg5[%c0_12, %c0_13] : memref<8x128xf32, #tpu.memory_space<vmem>>, vector<8x128xf32>
      tpu.vector_store %arg5[%c0_12, %c0_13], %110 {strides = array<i32>} : memref<8x128xf32, #tpu.memory_space<vmem>>, vector<8x128xf32>,
    } else {
    }
    return
  }
  func.func @transform_0(%arg0: i32, %arg1: i32, %arg2: i32) -> (i32, i32) {
    %c0_i32 = arith.constant 0 : i32
    return %arg0, %arg2 : i32, i32
  }
  func.func @transform_1(%arg0: i32, %arg1: i32, %arg2: i32) -> (i32, i32) {
    %c0_i32 = arith.constant 0 : i32
    return %arg2, %arg1 : i32, i32
  }
  func.func @transform_2(%arg0: i32, %arg1: i32, %arg2: i32) -> (i32, i32) {
    %c0_i32 = arith.constant 0 : i32
    return %arg0, %arg1 : i32, i32
  }
}

</mosaic_0001>

<bundles_post_ra>
// kernel: tpu_custom_call.1
= control target key start
LH: loop header
LB: loop body
LE: loop exit
PB: predicated region body
PF: predicated region fallthrough
CT: control target
= control target key end

     0   :  { %7 = vsyncpa [#allocation4], 0  ;;  %s358_s0 = inlined_call_operand.hbm [shape: f32[8,16], index: 0, kind: input, shape index: {}]   ;;  %s359_s1 = inlined_call_operand.hbm [shape: f32[16,128], index: 1, kind: input, shape index: {}]   ;;  %s360_s2 = inlined_call_operand.hbm [shape: f32[8,128], index: 2, kind: output, shape index: {}]  }
   0x1   :  { %8 = vsyncpa [#allocation7], 0 }
   0x2   :  { %9 = vsyncpa [#allocation5], 0  ;;  %s15_s11 = sshll.u32 %s358_s0, 4  ;;  %s313_s12 = smov [#allocation3]   ;;  %s16_s11 = int_to_ptr.hbm [resolvable:$true] %s15_s11 }
   0x3   :  { %s17_s13 = sshll.u32 %s313_s12, 4  ;;  %s25_s16 = sshll.u32 %s359_s1, 4  ;;  %s18_s13 = int_to_ptr.vmem [resolvable:$true] %s17_s13  ;;  %s26_s16 = int_to_ptr.hbm [resolvable:$true] %s25_s16 }
   0x4   :  { %20 = dma.hbm_to_vmem [thread:$0]  %s16_s11, 128, %s18_s13, [#allocation4]  }
   0x5   :  { %s314_s17 = smov [#allocation6]   ;;  %s315_s19 = smov 128  }
   0x6   :  { %s27_s18 = sshll.u32 %s314_s17, 4  ;;  %s316_s20 = smov 8   ;;  %s28_s18 = int_to_ptr.vmem [resolvable:$true] %s27_s18 }
   0x7   :  { %33 = dma.hbm_to_vmem [thread:$0]  %s26_s16, 256, %s28_s18, [#allocation7], %s315_s19, %s315_s19, %s316_s20  }
   0x8   :  { %307 = dma.done.wait [#allocation4], 128  }
   0x9   :  { %308 = vsyncadd [#allocation4], 4294967168 }
   0xa   :  { %309 = dma.done.wait [#allocation7], 256  }
   0xb   :  { %310 = vsyncadd [#allocation7], 4294967040  ;;  %v317_v0 = vmov 2   ;;  %v318_v1 = vmov 0   ;;  %v319_v2 = vmov 4   ;;  %v47_v3 = vld [vmem:[#allocation3] sm:$0xff] }
   0xc   :  { %216 = vset.pattern.permute.xlu1 %v317_v0  ;;  %214 = vset.pattern.permute.xlu0 %v318_v1  ;;  %231 = vlog2.f32 %v47_v3  ;;  %v320_v7 = vmov 3   ;;  %v321_v8 = vmov 1   ;;  %v322_v9 = vmov 5   ;;  %v51_v23 = vld [vmem:[#allocation6] sm:$0xff]  ;;  %v52_v49 = vld [vmem:[#allocation6 + $0x8] sm:$0xff]  ;;  %s333_s0 = smov [#allocation8]  }
   0xd   :  { %218 = vset.pattern.permute.xlu2 %v319_v2  ;;  %v323_v10 = vmov 6   ;;  %v324_v11 = vmov 8   ;;  %v325_v12 = vmov 7   ;;  %v326_v13 = vmov 9   ;;  %s180_s1 = sshll.u32 %s333_s0, 4  ;;  %s182_s23 = sshll.u32 %s360_s2, 4  ;;  %s181_s1 = int_to_ptr.vmem [resolvable:$true] %s180_s1  ;;  %s183_s23 = int_to_ptr.hbm [resolvable:$true] %s182_s23 }
   0xe   :  { %v327_v14 = vmov 13   ;;  %v328_v15 = vmov 10   ;;  %v329_v16 = vmov 11   ;;  %v330_v17 = vmov 15  }
   0xf   :  { %v331_v18 = vmov 12   ;;  %v332_v19 = vmov 14   ;;  %v59_v25 = vperm.slane %v51_v23, 0  ;;  %v66_v26 = vperm.slane %v51_v23, 1 }
  0x10   :  { %v73_v27 = vperm.slane %v51_v23, 2  ;;  %v80_v31 = vperm.slane %v51_v23, 3  ;;  %v87_v34 = vperm.slane %v51_v23, 4  ;;  %v94_v39 = vperm.slane %v51_v23, 5 }
  0x11   :  { %v101_v40 = vperm.slane %v51_v23, 6  ;;  %v108_v47 = vperm.slane %v51_v23, 7  ;;  %v115_v52 = vperm.slane %v52_v49, 0  ;;  %v122_v55 = vperm.slane %v52_v49, 1 }
  0x12   :  { %v232_v4 = vpop.eup %231  ;;  %v129_v60 = vperm.slane %v52_v49, 2  ;;  %v136_v0 = vperm.slane %v52_v49, 3  ;;  %v143_v2 = vperm.slane %v52_v49, 4 }
  0x13   :  { %v49_v5 = vmul.f32 0.6931472, %v232_v4 }
  0x15   :  { %v50_v6 = vmax.f32 %v49_v5, -1e+30 }
  0x17   :  { %70 = vperm.xlu1 %216, %v50_v6   ;;  %56 = vperm.xlu0 %214, %v50_v6  }
  0x18   :  { %84 = vperm.xlu2 %218, %v50_v6  }
  0x1f   :  { %217 = vset.pattern.permute.xlu1 %v320_v7  ;;  %215 = vset.pattern.permute.xlu0 %v321_v8  ;;  %v150_v7 = vperm.slane %v52_v49, 5 }
  0x20   :  { %77 = vperm.xlu1 %217, %v50_v6   ;;  %63 = vperm.xlu0 %215, %v50_v6  }
  0x21   :  { %219 = vset.pattern.permute.xlu2 %v322_v9 }
  0x22   :  { %91 = vperm.xlu2 %219, %v50_v6  }
  0x28   :  { %220 = vset.pattern.permute.xlu1 %v323_v10  ;;  %222 = vset.pattern.permute.xlu0 %v324_v11 }
  0x29   :  { %98 = vperm.xlu1 %220, %v50_v6   ;;  %112 = vperm.xlu0 %222, %v50_v6  }
  0x2a   :  { %221 = vset.pattern.permute.xlu2 %v325_v12  ;;  %v157_v12 = vperm.slane %v52_v49, 6 }
  0x2b   :  { %105 = vperm.xlu2 %221, %v50_v6  }
  0x31   :  { %223 = vset.pattern.permute.xlu1 %v326_v13  ;;  %227 = vset.pattern.permute.xlu0 %v327_v14  ;;  %v164_v13 = vperm.slane %v52_v49, 7 }
  0x32   :  { %119 = vperm.xlu1 %223, %v50_v6   ;;  %147 = vperm.xlu0 %227, %v50_v6  }
  0x33   :  { %224 = vset.pattern.permute.xlu2 %v328_v15 }
  0x34   :  { %126 = vperm.xlu2 %224, %v50_v6  }
  0x3a   :  { %225 = vset.pattern.permute.xlu1 %v329_v16  ;;  %230 = vset.pattern.permute.xlu0 %v330_v17 }
  0x3b   :  { %133 = vperm.xlu1 %225, %v50_v6  }
  0x3c   :  { %226 = vset.pattern.permute.xlu2 %v331_v18 }
  0x3d   :  { %140 = vperm.xlu2 %226, %v50_v6  }
  0x43   :  { %228 = vset.pattern.permute.xlu1 %v332_v19 }
  0x44   :  { %154 = vperm.xlu1 %228, %v50_v6  }
  0x45   :  { %229 = vset.pattern.permute.xlu2 %v330_v17 }
  0x46   :  { %161 = vperm.xlu2 %229, %v50_v6  }
  0x72   :  { %v85_v20 = vpop.permute.xlu2 %84 }
  0x73   :  { %v88_v41 = vmul.f32 %v87_v34, %v85_v20 }
  0x7c   :  { %v92_v24 = vpop.permute.xlu2 %91 }
  0x7d   :  { %v95_v44 = vmul.f32 %v94_v39, %v92_v24 }
  0x85   :  { %v106_v36 = vpop.permute.xlu2 %105 }
  0x86   :  { %v109_v51 = vmul.f32 %v108_v47, %v106_v36 }
  0x89   :  { %v71_v21 = vpop.permute.xlu1 %70  ;;  %v57_v22 = vpop.permute.xlu0 %56 }
  0x8a   :  { %v60_v28 = vmul.f32 %v59_v25, %v57_v22  ;;  %v74_v33 = vmul.f32 %v73_v27, %v71_v21 }
  0x8e   :  { %v127_v53 = vpop.permute.xlu2 %126 }
  0x8f   :  { %v130_v63 = vmul.f32 %v129_v60, %v127_v53 }
  0x92   :  { %v78_v29 = vpop.permute.xlu1 %77  ;;  %v64_v30 = vpop.permute.xlu0 %63 }
  0x93   :  { %v67_v32 = vmul.f32 %v66_v26, %v64_v30  ;;  %v81_v37 = vmul.f32 %v80_v31, %v78_v29 }
  0x95   :  { %v68_v35 = vmin.f32 %v60_v28, %v67_v32 }
  0x97   :  { %v75_v38 = vmin.f32 %v68_v35, %v74_v33  ;;  %v141_v1 = vpop.permute.xlu2 %140 }
  0x98   :  { %v144_v6 = vmul.f32 %v143_v2, %v141_v1 }
  0x99   :  { %v82_v42 = vmin.f32 %v75_v38, %v81_v37 }
  0x9b   :  { %v89_v43 = vmin.f32 %v82_v42, %v88_v41  ;;  %v99_v45 = vpop.permute.xlu1 %98  ;;  %v113_v54 = vpop.permute.xlu0 %112 }
  0x9c   :  { %v102_v46 = vmul.f32 %v101_v40, %v99_v45  ;;  %v116_v57 = vmul.f32 %v115_v52, %v113_v54 }
  0x9d   :  { %v96_v48 = vmin.f32 %v89_v43, %v95_v44 }
  0x9f   :  { %v103_v50 = vmin.f32 %v96_v48, %v102_v46 }
  0xa0   :  { %v162_v14 = vpop.permute.xlu2 %161 }
  0xa1   :  { %v110_v56 = vmin.f32 %v103_v50, %v109_v51  ;;  %v165_v18 = vmul.f32 %v164_v13, %v162_v14 }
  0xa3   :  { %v117_v61 = vmin.f32 %v110_v56, %v116_v57 }
  0xa4   :  { %v120_v58 = vpop.permute.xlu1 %119  ;;  %v148_v9 = vpop.permute.xlu0 %147 }
  0xa5   :  { %v123_v59 = vmul.f32 %v122_v55, %v120_v58  ;;  %v151_v11 = vmul.f32 %v150_v7, %v148_v9 }
  0xa7   :  { %v124_v62 = vmin.f32 %v117_v61, %v123_v59 }
  0xa9   :  { %v131_v4 = vmin.f32 %v124_v62, %v130_v63 }
  0xad   :  { %v134_v3 = vpop.permute.xlu1 %133 }
  0xae   :  { %v137_v5 = vmul.f32 %v136_v0, %v134_v3 }
  0xb0   :  { %v138_v8 = vmin.f32 %v131_v4, %v137_v5 }
  0xb2   :  { %v145_v10 = vmin.f32 %v138_v8, %v144_v6 }
  0xb4   :  { %v152_v16 = vmin.f32 %v145_v10, %v151_v11 }
  0xb6   :  { %v155_v15 = vpop.permute.xlu1 %154 }
  0xb7   :  { %v158_v17 = vmul.f32 %v157_v12, %v155_v15 }
  0xb9   :  { %v159_v19 = vmin.f32 %v152_v16, %v158_v17 }
  0xbb   :  { %v166_v20 = vmin.f32 %v159_v19, %v165_v18 }
  0xbd   :  { %v172_v21 = vmul.f32 1.442695, %v166_v20 }
  0xbf   :  { %233 = vpow2.f32 %v172_v21 }
  0xc5   :  { %v234_v22 = vpop.eup %233 }
  0xc6   :  { %174 = vst [vmem:[#allocation8] sm:$0xff] %v234_v22 }
  0xc7   :  { %185 = dma.vmem_to_hbm [thread:$0]  %s181_s1, 128, %s183_s23, [#allocation5]  }
  0xc8   :  { %311 = dma.done.wait [#allocation5], 128  }
  0xc9   :  { %312 = vsyncadd [#allocation5], 4294967168 }
  0xca   :  { %190 = vsyncpa [#allocation4], 1 }
  0xcb   :  { %191 = vsyncpa [#allocation7], 1 }
  0xcc   :  { %192 = vsyncpa [#allocation5], 1 }

</bundles_post_ra>
